<compile_context>
chip_gen: v7x
topology: tpu7x:2x2x1
jax: 0.10.0
libtpu: 0.0.40
codegen_flags: <defaults>
</compile_context>

<pallas_src>
import numpy as np
from enum import Enum

import jax
import jax.numpy as jnp
from jax import lax
from jax.experimental import pallas as pl
from jax.experimental.pallas import tpu as pltpu

CNNL_DIM_MAX = 8


class reshapeFormat(Enum):
    Split = 0
    Merge = 1
    Insert = 2
    Eliminate = 3


# ---------------------------------------------------------------------------
# Parameter generators: exact ports of the PyTorch helpers.  They read only
# .shape / .ndim, so the np.random call order (and thus the drawn parameters)
# matches the original module bit-for-bit, even under jit tracing.
# ---------------------------------------------------------------------------
def get_permute_parameter(x):
    dim_vec = np.arange(x.ndim)
    np.random.shuffle(dim_vec)
    return [int(d) for d in dim_vec]


def get_reshape_parameter(x):
    tensor_size = list(x.shape)
    reshape_format = np.random.randint(
        reshapeFormat.Split.value, reshapeFormat.Eliminate.value + 1
    )
    if len(tensor_size) in (0, 1):
        reshape_format = reshapeFormat.Insert.value
        dim = 0
    elif len(tensor_size) >= CNNL_DIM_MAX:
        reshape_format = reshapeFormat.Eliminate.value
        dim = np.random.randint(0, CNNL_DIM_MAX)
    else:
        dim = np.random.randint(0, len(tensor_size))

    if reshape_format == reshapeFormat.Split.value:
        if len(tensor_size) == CNNL_DIM_MAX:
            return tensor_size
        base_split_value = 0
        for i in range(2, 6):
            if tensor_size[dim] % i == 0:
                base_split_value = i
                break
        if base_split_value != 0:
            tensor_size[dim] = int(tensor_size[dim] / base_split_value)
            tensor_size.insert(dim, base_split_value)
        return tensor_size
    elif reshape_format == reshapeFormat.Merge.value:
        another_dim = dim + 1 if dim == 0 else dim - 1
        tensor_size[dim] *= tensor_size[another_dim]
        tensor_size.pop(another_dim)
        return tensor_size
    elif reshape_format == reshapeFormat.Insert.value:
        insert_num = np.random.randint(0, 3)
        insert_num = (
            CNNL_DIM_MAX - len(tensor_size)
            if len(tensor_size) + insert_num > CNNL_DIM_MAX
            else insert_num
        )
        for _ in range(insert_num):
            tensor_size.insert(dim, 1)
        return tensor_size
    else:
        pop_num = np.random.randint(0, 3)
        remove_value = 1
        for _ in range(pop_num):
            if remove_value in tensor_size:
                tensor_size.remove(remove_value)
        return tensor_size


def get_select_parameter(x):
    tensor_size = list(x.shape)
    dim_value = 1
    flag = 0
    if len(tensor_size) == 0:
        return (0, 0)
    dim = np.random.randint(0, len(tensor_size))
    while dim_value <= 1 and flag < len(tensor_size):
        dim = 0 if dim == len(tensor_size) - 1 else dim + 1
        dim_value = tensor_size[dim]
        flag += 1
    if dim_value == 1:
        return (0, 0)
    index = np.random.randint(1, dim_value)
    return (int(dim), int(index))


# ---------------------------------------------------------------------------
# Pallas kernel: the only compute in the module, `x + 1`.
# ---------------------------------------------------------------------------
def add_one_kernel(x_ref, o_ref):
    # Weak-typed Python literal keeps the input dtype (float or int), matching
    # PyTorch's dtype-preserving `x + 1`.
    o_ref[...] = x_ref[...] + 1


def pallas_add_one(x):
    """Dtype-preserving `x + 1` in a gridless Pallas kernel on a lane-dense slab."""
    orig_shape = x.shape
    n = x.size
    assert n > 0, "empty tensor reached the Pallas kernel"

    # Present the contiguous data as a lane-dense (rows, 128) 2-D slab so the
    # kernel issues full-lane, unmasked loads/stores with zero lane padding.
    # Pure metadata reshape (no relayout) for a contiguous input.
    if n % 128 == 0:
        flat = jnp.reshape(x, (n // 128, 128))
    else:
        # TODO(synk): payloads that are not a multiple of 128 keep a single
        # (1, n) block; some lane padding is unavoidable there.
        flat = jnp.reshape(x, (1, n))

    out = pl.pallas_call(
        add_one_kernel,
        out_shape=jax.ShapeDtypeStruct(flat.shape, flat.dtype),
        # Gridless call: one full-array block resident in VMEM.  No grid loop,
        # no pipeline prologue/epilogue, no scratch for this ~2-vreg payload.
        in_specs=[pl.BlockSpec(memory_space=pltpu.MemorySpace.VMEM)],
        out_specs=pl.BlockSpec(memory_space=pltpu.MemorySpace.VMEM),
    )(flat)
    return jnp.reshape(out, orig_shape)


# ---------------------------------------------------------------------------
# ViewChain6 forward: compute (+1) in Pallas, view glue in plain JAX.
# The elementwise add commutes with every select / permute / reshape, so
# applying it first is numerically identical to the PyTorch module while
# letting the kernel run lane-dense on the contiguous natural-shape input.
# Parameters are resolved from shapes only (static at trace time), so the
# whole function jits into one executable.
# ---------------------------------------------------------------------------
def viewchain6_forward(x):
    # The only compute of the module: x + 1  -> Pallas TPU kernel (hoisted).
    x = pallas_add_one(x)

    # --- pure metadata view chain (matches the PyTorch module exactly) -----
    # select #1
    dim, index = get_select_parameter(x)
    if x.ndim != 0:
        x = lax.index_in_dim(x, index, axis=dim, keepdims=False)
    # select #2
    dim, index = get_select_parameter(x)
    if x.ndim != 0:
        x = lax.index_in_dim(x, index, axis=dim, keepdims=False)
    # permute
    x = jnp.transpose(x, get_permute_parameter(x))
    # reshape x2
    x = jnp.reshape(x, get_reshape_parameter(x))
    x = jnp.reshape(x, get_reshape_parameter(x))
    # permute
    x = jnp.transpose(x, get_permute_parameter(x))
    # reshape
    x = jnp.reshape(x, get_reshape_parameter(x))
    # select #3
    dim, index = get_select_parameter(x)
    if x.ndim != 0:
        x = lax.index_in_dim(x, index, axis=dim, keepdims=False)
    # reshape
    x = jnp.reshape(x, get_reshape_parameter(x))
    # select #4
    dim, index = get_select_parameter(x)
    if x.ndim != 0:
        x = lax.index_in_dim(x, index, axis=dim, keepdims=False)
    return x


if __name__ == "__main__":
    # Deterministic view-chain parameters (the PyTorch module draws them from
    # numpy's global RNG at forward time).
    np.random.seed(0)

    key = jax.random.PRNGKey(0)
    x = jax.random.normal(key, (2, 4, 16, 16), dtype=jnp.float32)

    # jit the whole forward: view-chain params are Python ints resolved at
    # trace time, so the traced program is a single executable with the
    # Pallas custom call as its only launch and the views as free metadata.
    fwd = jax.jit(viewchain6_forward)
    out = jax.block_until_ready(fwd(x))

    # Pure-JAX reference with the add applied at the END of the chain, exactly
    # as in the PyTorch module, to validate the hoisted-add placement.
    np.random.seed(0)

    def ref_forward(x):
        dim, index = get_select_parameter(x)
        if x.ndim != 0:
            x = lax.index_in_dim(x, index, axis=dim, keepdims=False)
        dim, index = get_select_parameter(x)
        if x.ndim != 0:
            x = lax.index_in_dim(x, index, axis=dim, keepdims=False)
        x = jnp.transpose(x, get_permute_parameter(x))
        x = jnp.reshape(x, get_reshape_parameter(x))
        x = jnp.reshape(x, get_reshape_parameter(x))
        x = jnp.transpose(x, get_permute_parameter(x))
        x = jnp.reshape(x, get_reshape_parameter(x))
        dim, index = get_select_parameter(x)
        if x.ndim != 0:
            x = lax.index_in_dim(x, index, axis=dim, keepdims=False)
        x = jnp.reshape(x, get_reshape_parameter(x))
        dim, index = get_select_parameter(x)
        if x.ndim != 0:
            x = lax.index_in_dim(x, index, axis=dim, keepdims=False)
        # Weak-typed `+ 1` to stay dtype-preserving, same as the kernel.
        return x + 1

    ref = jax.block_until_ready(ref_forward(x))
    assert out.shape == ref.shape and out.dtype == ref.dtype
    assert np.allclose(np.asarray(out), np.asarray(ref), atol=1e-6)

    print("KERNEL_OK")
</pallas_src>

<mosaic_0001>
module attributes {stable_mosaic.version = 11 : i64} {
  func.func @add_one_kernel(%arg0: memref<16x128xf32, #tpu.memory_space<vmem>>, %arg1: memref<16x128xf32, #tpu.memory_space<vmem>>) attributes {dimension_semantics = [], scalar_prefetch = 0 : i64, scratch_operands = 0 : i64, tpu.core_type = #tpu.core_type<tc>} {
    %c0 = arith.constant 0 : index
    %c0_0 = arith.constant 0 : index
    %0 = vector.load %arg0[%c0, %c0_0] : memref<16x128xf32, #tpu.memory_space<vmem>>, vector<16x128xf32>
    %cst = arith.constant 1.000000e+00 : f32
    %1 = vector.broadcast %cst : f32 to vector<16x128xf32>
    %2 = arith.addf %0, %1 : vector<16x128xf32>
    %c0_1 = arith.constant 0 : index
    %c0_2 = arith.constant 0 : index
    %3 = vector.load %arg1[%c0_1, %c0_2] : memref<16x128xf32, #tpu.memory_space<vmem>>, vector<16x128xf32>
    tpu.vector_store %arg1[%c0_1, %c0_2], %2 {strides = array<i32>} : memref<16x128xf32, #tpu.memory_space<vmem>>, vector<16x128xf32>,
    return
  }
}

</mosaic_0001>

<bundles_post_ra>
// kernel: viewchain6_forward.1
= control target key start
LH: loop header
LB: loop body
LE: loop exit
PB: predicated region body
PF: predicated region fallthrough
CT: control target
= control target key end

     0   :  { %s40_s0 = inlined_call_operand.vmem [shape: f32[16,128], index: 0, kind: input, shape index: {}]   ;;  %s41_s1 = inlined_call_operand.vmem [shape: f32[16,128], index: 1, kind: output, shape index: {}]  }
   0x1   :  { %v8_v0 = vld [vmem:[%s40_s0] sm:$0xff]  ;;  %v9_v1 = vld [vmem:[%s40_s0 + $0x8] sm:$0xff] }
   0x2   :  { %v10_v2 = vadd.f32 1.0, %v8_v0  ;;  %v11_v3 = vadd.f32 1.0, %v9_v1 }
   0x4   :  { %12 = vst [vmem:[%s41_s1] sm:$0xff] %v10_v2  ;;  %13 = vst [vmem:[%s41_s1 + $0x8] sm:$0xff] %v11_v3 }

</bundles_post_ra>
